<compile_context>
chip_gen: v7x
topology: tpu7x:2x2x1
jax: 0.10.0
libtpu: 0.0.40
codegen_flags: <defaults>
</compile_context>

<pallas_src>
import numpy as np
import jax
import jax.numpy as jnp
from jax.experimental import pallas as pl
from jax.experimental.pallas import tpu as pltpu


# ----------------------------- parameter construction (glue, plain JAX) -----------------------------

def build_window(n_fft, window_fn="hann"):
    # torch.hann_window(n_fft, periodic=True)
    assert window_fn == "hann"
    k = jnp.arange(n_fft, dtype=jnp.float32)
    return 0.5 - 0.5 * jnp.cos(2.0 * jnp.pi * k / n_fft)


def build_optimal_window(window, hop_length):
    n = window.shape[0]
    reps = n // hop_length
    windows = jnp.stack([jnp.roll(window, hop_length * i) for i in range(reps)], axis=0)
    norm = jnp.sum(windows ** 2, axis=0)
    return window / norm


def build_fourier_bases(n_fft, normalize=False):
    k = jnp.arange(n_fft, dtype=jnp.float32)
    n = jnp.arange(n_fft, dtype=jnp.float32)
    K, N = jnp.meshgrid(k, n, indexing="ij")
    cos_b = jnp.cos(2.0 * jnp.pi * K * N / n_fft)
    sin_b = jnp.sin(2.0 * jnp.pi * K * N / n_fft)
    if normalize:
        cos_b = cos_b / jnp.sqrt(jnp.float32(n_fft))
        sin_b = sin_b / jnp.sqrt(jnp.float32(n_fft))
    return cos_b, sin_b


def make_folded_bases(n_fft, hop_length, window_fn="hann", normalize=False):
    """BatchInvSTFT bases with the forward-time channel duplication folded in.

    The PyTorch forward duplicates interior-bin channels (real[:,1:-1], imag[:,1:-1])
    and the corresponding basis rows.  Algebraically identical: scale interior-bin
    rows (bins 1 .. n_fft//2-1) of both cos and sin blocks by 2 and keep C = n_fft+2.
    DC (bin 0) and Nyquist (bin n_fft//2) are NOT doubled.

    Returns W of shape (n_fft + 2, n_fft), float32.
    """
    n_bins = n_fft // 2 + 1
    window = build_window(n_fft, window_fn)
    optimal_window = build_optimal_window(window, hop_length)
    cos_b, sin_b = build_fourier_bases(n_fft, normalize=normalize)
    cos_b = cos_b[:n_bins] * optimal_window
    sin_b = -sin_b[:n_bins] * optimal_window
    if not normalize:
        cos_b = cos_b / n_fft
        sin_b = sin_b / n_fft
    scale = jnp.ones((n_bins, 1), jnp.float32).at[1:n_bins - 1].set(2.0)
    cos_b = cos_b * scale
    sin_b = sin_b * scale
    return jnp.concatenate([cos_b, sin_b], axis=0).astype(jnp.float32)  # (n_fft+2, n_fft)


# ----------------------------- Pallas kernel (hot path: matmul + overlap-add) -----------------------------

def _istft_ola_kernel(x_ref, w_ref, o_ref):
    # x_ref: (1, TF, C)      -- this tile's frames, contraction dim last
    # w_ref: (C, n_fft)      -- folded bases (constant index_map -> resident)
    # o_ref: (1, M_pad, hop) -- full folded output for this batch; resident accumulator
    fi = pl.program_id(1)
    TF = x_ref.shape[1]
    n_fft = w_ref.shape[1]
    hop = o_ref.shape[2]
    R = n_fft // hop  # overlap factor (n_fft % hop == 0 assumed)

    @pl.when(fi == 0)
    def _init():
        o_ref[...] = jnp.zeros_like(o_ref)

    # per-frame time-domain segments on the MXU, f32 accumulation
    seg = jnp.dot(x_ref[0], w_ref[...], preferred_element_type=jnp.float32)  # (TF, n_fft)

    # overlap-add with stride = hop: R static slice-accumulates directly into
    # the resident output block (no padded temporaries, no live (M,hop) value).
    base = pl.multiple_of(fi * TF, TF)
    for q in range(R):
        o_ref[0, pl.ds(base + q, TF), :] += seg[:, q * hop:(q + 1) * hop]


def batch_inv_stft(spec, n_fft, hop_length=None, T=None, window_fn="hann",
                   normalize=False, use_bf16=False, frame_tile=256):
    """spec: (B, n_bins, n_frames, 2) float32 -> (B, T_out) float32.

    frame_tile: frames per grid step (use 128 on v5e; 256 on v6e/v7x). Must be a
                multiple of 8 when smaller than the padded frame count.
    use_bf16:   cast X/W to bf16 for the MXU (f32 accumulate). Off by default to
                keep strict 1e-4 agreement with the f64 reference.
    """
    if hop_length is None:
        hop_length = n_fft // 2
    # TODO(synk): general hop that does not divide n_fft needs a dynamic scatter-add OLA.
    assert n_fft % hop_length == 0, "kernel assumes n_fft % hop_length == 0"

    B, n_bins, F_, _ = spec.shape
    assert n_bins == n_fft // 2 + 1
    hop = hop_length
    R = n_fft // hop

    W = make_folded_bases(n_fft, hop, window_fn=window_fn, normalize=normalize)  # (C, n_fft)
    C = W.shape[0]  # n_fft + 2 (duplication folded into W)

    # channel stacking: only [real, imag]; the interior-bin duplication lives in W now
    real, imag = spec[..., 0], spec[..., 1]
    x = jnp.concatenate([real, imag], axis=1)                 # (B, C, F)
    x = jnp.transpose(x, (0, 2, 1)).astype(jnp.float32)       # (B, F, C)

    # frame tiling (pad with zero frames; zeros contribute nothing to the OLA)
    if F_ <= frame_tile:
        TF, F_pad = F_, F_
    else:
        TF = frame_tile
        F_pad = ((F_ + TF - 1) // TF) * TF
    if F_pad != F_:
        x = jnp.pad(x, ((0, 0), (0, F_pad - F_), (0, 0)))
    n_f_tiles = F_pad // TF

    M_pad = F_pad + R - 1
    L_out = (F_ - 1) * hop + n_fft

    compute_dtype = jnp.bfloat16 if use_bf16 else jnp.float32
    x_in = x.astype(compute_dtype)
    w_in = W.astype(compute_dtype)
    itemsize = 2 if use_bf16 else 4

    # explicit scoped-VMEM budget: 2x double-buffered X tile + W + resident output + seg temp
    vmem_est = (2 * TF * C + 2 * C * n_fft) * itemsize + (M_pad * hop + TF * n_fft) * 4 + (2 << 20)
    vmem_limit_bytes = int(min(max(vmem_est, 32 * 1024 * 1024), 56 * 1024 * 1024))

    folded = pl.pallas_call(
        _istft_ola_kernel,
        out_shape=jax.ShapeDtypeStruct((B, M_pad, hop), jnp.float32),
        grid_spec=pltpu.PrefetchScalarGridSpec(
            num_scalar_prefetch=0,
            grid=(B, n_f_tiles),
            in_specs=[
                pl.BlockSpec((1, TF, C), lambda b, f: (b, f, 0)),
                pl.BlockSpec((C, n_fft), lambda b, f: (0, 0)),   # resident, DMA'd once
            ],
            out_specs=pl.BlockSpec((1, M_pad, hop), lambda b, f: (b, 0, 0)),
        ),
        compiler_params=pltpu.CompilerParams(
            dimension_semantics=("parallel", "arbitrary"),
            vmem_limit_bytes=vmem_limit_bytes,
        ),
    )(x_in, w_in)

    y = folded.reshape(B, M_pad * hop)

    # negative padding (crop), same arithmetic as the PyTorch forward()
    if T is None:
        padding = 2 * n_fft
    else:
        padding = (hop - (T - n_fft) % hop) % hop + 2 * n_fft
    pad_left = padding // 2
    pad_right = padding - pad_left
    return y[:, pad_left: L_out - pad_right]


# ----------------------------- numpy reference (original conv_transpose1d semantics) -----------------------------

def reference_numpy(spec, n_fft, hop_length, T=None, normalize=False):
    """Replicates the original torch module (including the channel/bases duplication)."""
    n_bins = n_fft // 2 + 1
    k = np.arange(n_fft, dtype=np.float64)
    window = 0.5 - 0.5 * np.cos(2.0 * np.pi * k / n_fft)
    reps = n_fft // hop_length
    windows = np.stack([np.roll(window, hop_length * i) for i in range(reps)], axis=0)
    optimal_window = window / np.sum(windows ** 2, axis=0)
    K, N = np.meshgrid(np.arange(n_fft), np.arange(n_fft), indexing="ij")
    cos_b = np.cos(2.0 * np.pi * K * N / n_fft)
    sin_b = np.sin(2.0 * np.pi * K * N / n_fft)
    if normalize:
        cos_b = cos_b / np.sqrt(n_fft)
        sin_b = sin_b / np.sqrt(n_fft)
    cos_b = cos_b[:n_bins] * optimal_window
    sin_b = -sin_b[:n_bins] * optimal_window
    if not normalize:
        cos_b = cos_b / n_fft
        sin_b = sin_b / n_fft
    bases = np.concatenate([cos_b, sin_b], axis=0)                                        # (n_fft+2, n_fft)
    bases = np.concatenate([bases, bases[1:n_fft // 2], bases[-n_fft // 2:-1]], axis=0)   # (2*n_fft, n_fft)

    spec = np.asarray(spec, dtype=np.float64)
    real, imag = spec[..., 0], spec[..., 1]
    x = np.concatenate([real, imag, real[:, 1:-1], imag[:, 1:-1]], axis=1)                # (B, 2*n_fft, F)
    B, _, F_ = x.shape
    L_out = (F_ - 1) * hop_length + n_fft
    y = np.zeros((B, L_out), dtype=np.float64)
    for f in range(F_):
        y[:, f * hop_length: f * hop_length + n_fft] += x[:, :, f] @ bases
    padding = 2 * n_fft if T is None else (hop_length - (T - n_fft) % hop_length) % hop_length + 2 * n_fft
    pad_left = padding // 2
    pad_right = padding - pad_left
    return y[:, pad_left: L_out - pad_right]


# ----------------------------- main -----------------------------

if __name__ == "__main__":
    n_fft = 16
    hop_length = n_fft // 2          # 8
    B = 2
    n_bins = n_fft // 2 + 1          # 9

    key = jax.random.PRNGKey(0)

    # test 1: single frame tile (F <= frame_tile)
    n_frames = 8
    spec = jax.random.normal(key, (B, n_bins, n_frames, 2), dtype=jnp.float32)
    out = jax.block_until_ready(batch_inv_stft(spec, n_fft, hop_length, T=None))
    ref = reference_numpy(np.asarray(spec), n_fft, hop_length, T=None)
    assert out.shape == ref.shape, (out.shape, ref.shape)
    assert np.allclose(np.asarray(out), ref, atol=1e-4, rtol=1e-4), \
        float(np.max(np.abs(np.asarray(out) - ref)))

    # test 2: multi-tile frame grid (exercises the output-resident accumulator path)
    n_frames2 = 40
    spec2 = jax.random.normal(jax.random.PRNGKey(1), (B, n_bins, n_frames2, 2), dtype=jnp.float32)
    out2 = jax.block_until_ready(batch_inv_stft(spec2, n_fft, hop_length, T=None, frame_tile=16))
    ref2 = reference_numpy(np.asarray(spec2), n_fft, hop_length, T=None)
    assert out2.shape == ref2.shape, (out2.shape, ref2.shape)
    assert np.allclose(np.asarray(out2), ref2, atol=1e-4, rtol=1e-4), \
        float(np.max(np.abs(np.asarray(out2) - ref2)))

    print("KERNEL_OK")
</pallas_src>

<mosaic_0001>
module attributes {stable_mosaic.version = 11 : i64} {
  func.func @_istft_ola_kernel(%arg0: i32, %arg1: i32, %arg2: memref<1x8x18xf32, #tpu.memory_space<vmem>>, %arg3: memref<18x16xf32, #tpu.memory_space<vmem>>, %arg4: memref<1x9x8xf32, #tpu.memory_space<vmem>>) attributes {dimension_semantics = [#tpu.dimension_semantics<parallel>, #tpu.dimension_semantics<arbitrary>], iteration_bounds = array<i64: 2, 1>, scalar_prefetch = 0 : i64, scratch_operands = 0 : i64, tpu.core_type = #tpu.core_type<tc>, window_params = [{transform_indices = @transform_0, window_bounds = array<i64: 1, 8, 18>}, {pipeline_mode = #tpu.pipeline_mode<synchronous>, transform_indices = @transform_1, window_bounds = array<i64: 18, 16>}, {transform_indices = @transform_2, window_bounds = array<i64: 1, 9, 8>}]} {
    %c0_i32 = arith.constant 0 : i32
    %0 = arith.cmpi eq, %arg1, %c0_i32 : i32
    %1 = arith.extui %0 : i1 to i32
    %c0_i32_0 = arith.constant 0 : i32
    %2 = arith.cmpi ne, %1, %c0_i32_0 : i32
    scf.if %2 {
      %cst_14 = arith.constant 0.000000e+00 : f32
      %29 = vector.broadcast %cst_14 : f32 to vector<1x9x8xf32>
      %c0_15 = arith.constant 0 : index
      %c0_16 = arith.constant 0 : index
      %c0_17 = arith.constant 0 : index
      %30 = vector.load %arg4[%c0_15, %c0_16, %c0_17] : memref<1x9x8xf32, #tpu.memory_space<vmem>>, vector<1x9x8xf32>
      tpu.vector_store %arg4[%c0_15, %c0_16, %c0_17], %29 {strides = array<i32>} : memref<1x9x8xf32, #tpu.memory_space<vmem>>, vector<1x9x8xf32>,
    } else {
    }
    %c0 = arith.constant 0 : index
    %c0_1 = arith.constant 0 : index
    %c0_2 = arith.constant 0 : index
    %3 = vector.load %arg2[%c0, %c0_1, %c0_2] : memref<1x8x18xf32, #tpu.memory_space<vmem>>, vector<1x8x18xf32>
    %4 = vector.shape_cast %3 : vector<1x8x18xf32> to vector<8x18xf32>
    %c0_3 = arith.constant 0 : index
    %c0_4 = arith.constant 0 : index
    %5 = vector.load %arg3[%c0_3, %c0_4] : memref<18x16xf32, #tpu.memory_space<vmem>>, vector<18x16xf32>
    %cst = arith.constant dense<0.000000e+00> : vector<8x16xf32>
    %6 = tpu.matmul %4, %5, %cst {dimension_numbers = #tpu.dot_dimension_numbers<[1], [0], [0], [1], [0, 0, 1, 1], [], []>} : vector<8x18xf32>, vector<18x16xf32>, vector<8x16xf32> -> vector<8x16xf32>
    %c8_i32 = arith.constant 8 : i32
    %7 = arith.muli %arg1, %c8_i32 : i32
    %8 = tpu.assume_multiple %7, 8 : i32
    %c0_i32_5 = arith.constant 0 : i32
    %9 = arith.addi %8, %c0_i32_5 : i32
    %c0_6 = arith.constant 0 : index
    %10 = arith.index_cast %9 : i32 to index
    %c0_7 = arith.constant 0 : index
    %11 = vector.load %arg4[%c0_6, %10, %c0_7] : memref<1x9x8xf32, #tpu.memory_space<vmem>>, vector<1x8x8xf32>
    %12 = vector.shape_cast %11 : vector<1x8x8xf32> to vector<8x8xf32>
    %13 = vector.extract_strided_slice %6 {offsets = [0, 0], sizes = [8, 8], strides = [1, 1]} : vector<8x16xf32> to vector<8x8xf32>
    %14 = arith.addf %12, %13 : vector<8x8xf32>
    %c0_8 = arith.constant 0 : index
    %15 = arith.index_cast %9 : i32 to index
    %c0_9 = arith.constant 0 : index
    %16 = vector.load %arg4[%c0_8, %15, %c0_9] : memref<1x9x8xf32, #tpu.memory_space<vmem>>, vector<1x8x8xf32>
    %17 = vector.shape_cast %16 : vector<1x8x8xf32> to vector<8x8xf32>
    %18 = vector.shape_cast %14 : vector<8x8xf32> to vector<1x8x8xf32>
    tpu.vector_store %arg4[%c0_8, %15, %c0_9], %18 {strides = array<i32>} : memref<1x9x8xf32, #tpu.memory_space<vmem>>, vector<1x8x8xf32>,
    %c1_i32 = arith.constant 1 : i32
    %19 = arith.addi %8, %c1_i32 : i32
    %c0_10 = arith.constant 0 : index
    %20 = arith.index_cast %19 : i32 to index
    %c0_11 = arith.constant 0 : index
    %21 = vector.load %arg4[%c0_10, %20, %c0_11] : memref<1x9x8xf32, #tpu.memory_space<vmem>>, vector<1x8x8xf32>
    %22 = vector.shape_cast %21 : vector<1x8x8xf32> to vector<8x8xf32>
    %23 = vector.extract_strided_slice %6 {offsets = [0, 8], sizes = [8, 8], strides = [1, 1]} : vector<8x16xf32> to vector<8x8xf32>
    %24 = arith.addf %22, %23 : vector<8x8xf32>
    %c0_12 = arith.constant 0 : index
    %25 = arith.index_cast %19 : i32 to index
    %c0_13 = arith.constant 0 : index
    %26 = vector.load %arg4[%c0_12, %25, %c0_13] : memref<1x9x8xf32, #tpu.memory_space<vmem>>, vector<1x8x8xf32>
    %27 = vector.shape_cast %26 : vector<1x8x8xf32> to vector<8x8xf32>
    %28 = vector.shape_cast %24 : vector<8x8xf32> to vector<1x8x8xf32>
    tpu.vector_store %arg4[%c0_12, %25, %c0_13], %28 {strides = array<i32>} : memref<1x9x8xf32, #tpu.memory_space<vmem>>, vector<1x8x8xf32>,
    return
  }
  func.func @transform_0(%arg0: i32, %arg1: i32) -> (i32, i32, i32) {
    %c0_i32 = arith.constant 0 : i32
    %c0_i32_0 = arith.constant 0 : i32
    return %arg0, %arg1, %c0_i32 : i32, i32, i32
  }
  func.func @transform_1(%arg0: i32, %arg1: i32) -> (i32, i32) {
    %c0_i32 = arith.constant 0 : i32
    %c0_i32_0 = arith.constant 0 : i32
    %c0_i32_1 = arith.constant 0 : i32
    return %c0_i32, %c0_i32_0 : i32, i32
  }
  func.func @transform_2(%arg0: i32, %arg1: i32) -> (i32, i32, i32) {
    %c0_i32 = arith.constant 0 : i32
    %c0_i32_0 = arith.constant 0 : i32
    %c0_i32_1 = arith.constant 0 : i32
    return %arg0, %c0_i32, %c0_i32_0 : i32, i32, i32
  }
}

</mosaic_0001>

<bundles_post_ra>
// kernel: tpu_custom_call.1
= control target key start
LH: loop header
LB: loop body
LE: loop exit
PB: predicated region body
PF: predicated region fallthrough
CT: control target
= control target key end

     0   :  { %s442_s9 = smov 0   ;;  %s444_s10 = smov 0   ;;  %s487_s0 = inlined_call_operand.vmem [shape: f32[2,8,18], index: 0, kind: input, shape index: {}]   ;;  %s488_s1 = inlined_call_operand.vmem [shape: f32[18,16], index: 1, kind: input, shape index: {}]   ;;  %s489_s2 = inlined_call_operand.vmem [shape: f32[2,9,8], index: 2, kind: output, shape index: {}]  }
   0x1   :  { %s446_s11 = smov 0  }
   0x2 LB: > { %s24_s12 = sadd.s32 1, %s417_s10  ;;  %p344_p0 = scmp.ge.s32.totalorder %s421_s11, 1  ;;  %s421_s11 = sphi %s446_s11, %s12_s11   ;;  %s417_s10 = sphi %s444_s10, %s491_s10   ;;  %s413_s9 = sphi %s442_s9, %s490_s9  }
   0x3   : > { %p26_p1 = scmp.ge.s32.totalorder %s24_s12, 2  ;;  %p128_p2 = scmp.lt.s32.totalorder %s421_s11, 3 }
   0x5   : > { %s493_s12 = smov (%p26_p1, %s24_s12), 0  ;;  %p129_p3 = pnand %p344_p0, %p128_p2 }
   0x6   : > { %v173_v0 = vld [vmem:[%s488_s1] sm:$0xff] (!%p129_p3)  ;;  %v174_v1 = vld [vmem:[%s488_s1 + $0x8] sm:$0xff] (!%p129_p3)  ;;  %v423_v2 = vmov (!%p129_p3), 0.0|0.0   ;;  %p152_p4 = scmp.lt.s32.totalorder (!%p129_p3), %s413_s9, 1  ;;  %vm424_vm0 = vmmov (!%p129_p3), 0   ;;  %v425_v4 = vmov (!%p129_p3), 0.0  }
   0x7   : > { %132 = sbr.rel (%p129_p3) target bundleno = 348 (0x15c), region = 28  ;;  %368 = vmatprep.subr.bf16.mxu0 (!%p129_p3), %v423_v2  ;;  %v369_v3 = vpack.c.bf16 (!%p129_p3), %v174_v1, %v173_v0  ;;  %365 = vmatprep.mubr.msk.f32.mxu0 (!%p129_p3), %vm424_vm0, %v425_v4  ;;  %v175_v5 = vld [vmem:[%s488_s1 + $0x10] sm:$0x3] (!%p129_p3)  ;;  %vm180_vm1 = vcmask (!%p129_p3), 1041408   ;;  %vm168_vm2 = vcmask (!%p129_p3), 64512   ;;  %vm170_vm3 = vcmask (!%p129_p3), 57344  }
   0x8   : > { %vm176_vm4 = vcmask (!%p129_p3), 146432   ;;  %s426_s27 = smov (!%p129_p3), 120  }
   0x9   : > { %370 = vmatpush3.bf16.msra.mxu0 (!%p129_p3), %v369_v3 }
   0xa   : > { %363 = vmatprep.subr.mxu0 (!%p129_p3), %v425_v4 }
   0xd   : > { %364 = vmatpush3.msk.msra.mxu0 (!%p129_p3), %vm180_vm1, %v175_v5 }
   0xe   : > { %s495_s9 = smov (!%p152_p4, %s413_s9), 1 }
   0xf   : > { %s345_s19 = sshll.u32 %s495_s9, 3  ;;  %s354_s20 = sshll.u32 %s495_s9, 4 }
  0x10   : > { %s158_s23 = scalar_lea.vmem %s487_s0, %s345_s19  ;;  %s163_s26 = scalar_lea.vmem %s489_s2, %s354_s20 }
  0x11   : > { %169 = vst.msk [vmem:[%s163_s26] sm:$0xff] %vm168_vm2, %v425_v4  ;;  %v172_v6 = vld [vmem:[%s158_s23] sm:$0xff] }
  0x12   : > { %171 = vst.msk [vmem:[%s163_s26 + $0x8] sm:$0x1] %vm170_vm3, %v425_v4  ;;  %366 = vmatmul.mubr.msk.f32.vlgmr.msra.gmra.mrb[0].mxu0 %vm176_vm4, %v172_v6 }
  0x18   : > { %v256_v7 = vld [vmem:[%s163_s26] sm:$0xff] }
  0xe5   : > { %v250_v8 = vpop.f32.mrb[0].mxu0 }
  0xe6   : > { %v257_v9 = vadd.f32 %v256_v7, %v250_v8  ;;  %v367_v10 = vpop.f32.mrb[1].mxu0  ;;  %264 = vrot.lane.b32.xlu0 %v250_v8, %s426_s27 }
  0xe8   : > { %259 = vst.msk [vmem:[%s163_s26] sm:$0xff] %vm168_vm2, %v257_v9 }
  0xef   : > { %v350_v11 = vld [vmem:[%s163_s26 + $0x1] sm:$0xff] }
 0x158   : > { %v265_v12 = vpop.permute.xlu0 %264 }
 0x159   : > { %v267_v13 = vadd.f32 %v350_v11, %v265_v12 }
 0x15b   : > { %351 = vst.msk [vmem:[%s163_s26 + $0x1] sm:$0xff] %vm168_vm2, %v267_v13 }
 0x15c PF: > { %s12_s11 = sadd.s32 1, %s421_s11   ;;  %s490_s9 = smov %s417_s10 }
 0x15d   : > { %p9_p5 = scmp.ge.s32.totalorder %s12_s11, 4   ;;  %s491_s10 = smov %s493_s12 }
 0x15f   :  { %11 = sbr.rel (!%p9_p5) target bundleno = 2 (0x2), region = 64 }

</bundles_post_ra>
